<compile_context>
chip_gen: v7x
topology: tpu7x:2x2x1
jax: 0.10.0
libtpu: 0.0.40
codegen_flags: <defaults>
</compile_context>

<pallas_src>
import jax
import jax.numpy as jnp
from jax.experimental import pallas as pl
from jax.experimental.pallas import tpu as pltpu


def _round_up(n, m):
    return ((n + m - 1) // m) * m


def _mlp_kernel(x_ref, w1_ref, b1_ref, w2_ref, b2_ref, w4_ref, o_ref):
    # x_ref: (tm, input_dim) f32 -> cast to bf16 in-kernel (hidden under DMA/MXU).
    x = x_ref[...].astype(jnp.bfloat16)
    h = jnp.dot(x, w1_ref[...], preferred_element_type=jnp.float32) + b1_ref[...]
    h = jnp.tanh(h)                                   # f32 tanh (safe on v5e too)
    h = jnp.dot(h.astype(jnp.bfloat16), w2_ref[...],
                preferred_element_type=jnp.float32) + b2_ref[...]
    h = jnp.tanh(h)
    o_ref[...] = jnp.dot(h.astype(jnp.bfloat16), w4_ref[...],
                         preferred_element_type=jnp.float32).astype(o_ref.dtype)


def prepare_params(params):
    """One-time weight preprocessing (hoisted out of the forward call):
    bf16 MXU operands + (1, hidden) f32 biases."""
    w1, b1, w2, b2, w4 = params
    hidden_dim = w1.shape[1]
    return (
        w1.astype(jnp.bfloat16),
        b1.reshape(1, hidden_dim).astype(jnp.float32),
        w2.astype(jnp.bfloat16),
        b2.reshape(1, hidden_dim).astype(jnp.float32),
        w4.astype(jnp.bfloat16),
    )


def _choose_tile(batch, tile_m):
    if batch <= 8:
        # Block == full row extent: legal (block dim equals array dim), and it
        # avoids any host-side row padding for tiny batches.
        return batch
    tm = min(tile_m, _round_up(batch, 8))
    # v7x megacore: keep >= 2 grid steps on the parallel batch axis when the
    # batch is large enough to split into 8-row-aligned tiles.
    if batch >= 16 and _round_up(batch, tm) // tm < 2:
        tm = _round_up((batch + 1) // 2, 8)
    return tm


def feedforward_pallas(x, prepared_params, tile_m=512):
    """x: (batch, d0, d1) with d0*d1 == input_dim.
    prepared_params: output of prepare_params(). Returns (batch, output_dim) f32."""
    w1_bf, b1_2d, w2_bf, b2_2d, w4_bf = prepared_params
    batch = x.shape[0]
    input_dim = w1_bf.shape[0]
    hidden_dim = w1_bf.shape[1]
    output_dim = w4_bf.shape[1]

    # Flatten exactly like torch.reshape in the module; keep f32 (cast in-kernel).
    x_re = jnp.reshape(x, (batch, input_dim)).astype(jnp.float32)

    tm = _choose_tile(batch, tile_m)
    batch_p = _round_up(batch, tm)
    if batch_p != batch:
        x_re = jnp.pad(x_re, ((0, batch_p - batch), (0, 0)))

    grid = (batch_p // tm,)

    # Weights / biases: constant index_map -> VMEM-resident across grid steps.
    def resident(a):
        nd = a.ndim
        return pl.BlockSpec(a.shape, lambda i, _nd=nd: (0,) * _nd)

    # Scoped-VMEM budget: cover resident weights (+double-buffer headroom) and
    # the pipelined activation/output tiles; clamp under v7x's 64 MiB physical.
    weight_bytes = sum(int(a.size) * a.dtype.itemsize
                       for a in (w1_bf, b1_2d, w2_bf, b2_2d, w4_bf))
    act_bytes = 2 * tm * (input_dim + hidden_dim + output_dim) * 4
    vmem_limit = min(max(32 << 20, 2 * weight_bytes + 2 * act_bytes + (4 << 20)),
                     60 << 20)

    out = pl.pallas_call(
        _mlp_kernel,
        out_shape=jax.ShapeDtypeStruct((batch_p, output_dim), jnp.float32),
        grid=grid,
        in_specs=[
            pl.BlockSpec((tm, input_dim), lambda i: (i, 0)),  # activations: tiled rows
            resident(w1_bf),
            resident(b1_2d),
            resident(w2_bf),
            resident(b2_2d),
            resident(w4_bf),
        ],
        # Last dim == full array dim (no lane padding): masked vst on a few valid
        # lanes is far cheaper than a 32x-inflated padded writeback + slice pass.
        out_specs=pl.BlockSpec((tm, output_dim), lambda i: (i, 0)),
        compiler_params=pltpu.CompilerParams(
            dimension_semantics=("parallel",),  # megacore on v7x; harmless elsewhere
            vmem_limit_bytes=vmem_limit,
        ),
    )(x_re, w1_bf, b1_2d, w2_bf, b2_2d, w4_bf)

    return out[:batch] if batch_p != batch else out


def init_params(key, input_dim, hidden_dim, output_dim):
    """torch.nn.Linear-style U(-1/sqrt(fan_in), 1/sqrt(fan_in)) init.
    Weights stored as (in_features, out_features) == torch weight transposed."""
    k1, k2, k3, k4, k5 = jax.random.split(key, 5)

    def u(k, shape, fan_in):
        bound = 1.0 / jnp.sqrt(fan_in)
        return jax.random.uniform(k, shape, jnp.float32, -bound, bound)

    w1 = u(k1, (input_dim, hidden_dim), input_dim)
    b1 = u(k2, (hidden_dim,), input_dim)
    w2 = u(k3, (hidden_dim, hidden_dim), hidden_dim)
    b2 = u(k4, (hidden_dim,), hidden_dim)
    w4 = u(k5, (hidden_dim, output_dim), hidden_dim)  # linear4 has bias=None
    return (w1, b1, w2, b2, w4)


def feedforward_ref(x, params):
    """Pure-JAX f32 reference matching the torch forward."""
    w1, b1, w2, b2, w4 = params
    batch = x.shape[0]
    x_re = jnp.reshape(x, (batch, w1.shape[0]))
    h = jnp.tanh(x_re @ w1 + b1)
    h = jnp.tanh(h @ w2 + b2)
    return h @ w4


# TODO(synk): time_derivative() uses torch.autograd over the forward; outside the
# kernel this is jax.grad over feedforward_pallas and is not part of the
# forward-pass kernel itself.

if __name__ == "__main__":
    # Small shapes consistent with the module: x is (batch, 2*state_size, k)
    # with (2*state_size)*k == input_dim.
    batch, input_dim, hidden_dim, output_dim = 2, 4, 32, 4
    key = jax.random.PRNGKey(0)
    kx, kp = jax.random.split(key)
    x = jax.random.normal(kx, (batch, 2, 2), jnp.float32)  # flattens to input_dim=4
    params = init_params(kp, input_dim, hidden_dim, output_dim)
    prepared = prepare_params(params)  # hoisted one-time weight preprocessing

    out = feedforward_pallas(x, prepared)
    out = jax.block_until_ready(out)

    ref = feedforward_ref(x, params)
    assert out.shape == (batch, output_dim), out.shape
    # bf16 MXU operands (f32 accumulate) vs full-f32 reference -> loose tolerance.
    assert jnp.allclose(out, ref, atol=5e-2, rtol=5e-2), (out, ref)

    print("KERNEL_OK")
</pallas_src>

<mosaic_0001>
module attributes {stable_mosaic.version = 11 : i64} {
  func.func @_mlp_kernel(%arg0: i32, %arg1: memref<2x4xf32, #tpu.memory_space<vmem>>, %arg2: memref<4x32xbf16, #tpu.memory_space<vmem>>, %arg3: memref<1x32xf32, #tpu.memory_space<vmem>>, %arg4: memref<32x32xbf16, #tpu.memory_space<vmem>>, %arg5: memref<1x32xf32, #tpu.memory_space<vmem>>, %arg6: memref<32x4xbf16, #tpu.memory_space<vmem>>, %arg7: memref<2x4xf32, #tpu.memory_space<vmem>>) attributes {dimension_semantics = [#tpu.dimension_semantics<parallel>], iteration_bounds = array<i64: 1>, scalar_prefetch = 0 : i64, scratch_operands = 0 : i64, tpu.core_type = #tpu.core_type<tc>, window_params = [{transform_indices = @transform_0, window_bounds = array<i64: 2, 4>}, {pipeline_mode = #tpu.pipeline_mode<synchronous>, transform_indices = @transform_1, window_bounds = array<i64: 4, 32>}, {pipeline_mode = #tpu.pipeline_mode<synchronous>, transform_indices = @transform_2, window_bounds = array<i64: 1, 32>}, {pipeline_mode = #tpu.pipeline_mode<synchronous>, transform_indices = @transform_3, window_bounds = array<i64: 32, 32>}, {pipeline_mode = #tpu.pipeline_mode<synchronous>, transform_indices = @transform_4, window_bounds = array<i64: 1, 32>}, {pipeline_mode = #tpu.pipeline_mode<synchronous>, transform_indices = @transform_5, window_bounds = array<i64: 32, 4>}, {transform_indices = @transform_6, window_bounds = array<i64: 2, 4>}]} {
    %c0 = arith.constant 0 : index
    %c0_0 = arith.constant 0 : index
    %0 = vector.load %arg1[%c0, %c0_0] : memref<2x4xf32, #tpu.memory_space<vmem>>, vector<2x4xf32>
    %1 = arith.truncf %0 : vector<2x4xf32> to vector<2x4xbf16>
    %c0_1 = arith.constant 0 : index
    %c0_2 = arith.constant 0 : index
    %2 = vector.load %arg2[%c0_1, %c0_2] : memref<4x32xbf16, #tpu.memory_space<vmem>>, vector<4x32xbf16>
    %cst = arith.constant dense<0.000000e+00> : vector<2x32xf32>
    %3 = tpu.matmul %1, %2, %cst {dimension_numbers = #tpu.dot_dimension_numbers<[1], [0], [0], [1], [0, 0, 1, 1], [], []>} : vector<2x4xbf16>, vector<4x32xbf16>, vector<2x32xf32> -> vector<2x32xf32>
    %c0_3 = arith.constant 0 : index
    %c0_4 = arith.constant 0 : index
    %4 = vector.load %arg3[%c0_3, %c0_4] : memref<1x32xf32, #tpu.memory_space<vmem>>, vector<1x32xf32>
    %5 = vector.broadcast %4 : vector<1x32xf32> to vector<2x32xf32>
    %6 = arith.addf %3, %5 : vector<2x32xf32>
    %7 = math.tanh %6 : vector<2x32xf32>
    %8 = arith.truncf %7 : vector<2x32xf32> to vector<2x32xbf16>
    %c0_5 = arith.constant 0 : index
    %c0_6 = arith.constant 0 : index
    %9 = vector.load %arg4[%c0_5, %c0_6] : memref<32x32xbf16, #tpu.memory_space<vmem>>, vector<32x32xbf16>
    %cst_7 = arith.constant dense<0.000000e+00> : vector<2x32xf32>
    %10 = tpu.matmul %8, %9, %cst_7 {dimension_numbers = #tpu.dot_dimension_numbers<[1], [0], [0], [1], [0, 0, 1, 1], [], []>} : vector<2x32xbf16>, vector<32x32xbf16>, vector<2x32xf32> -> vector<2x32xf32>
    %c0_8 = arith.constant 0 : index
    %c0_9 = arith.constant 0 : index
    %11 = vector.load %arg5[%c0_8, %c0_9] : memref<1x32xf32, #tpu.memory_space<vmem>>, vector<1x32xf32>
    %12 = vector.broadcast %11 : vector<1x32xf32> to vector<2x32xf32>
    %13 = arith.addf %10, %12 : vector<2x32xf32>
    %14 = math.tanh %13 : vector<2x32xf32>
    %15 = arith.truncf %14 : vector<2x32xf32> to vector<2x32xbf16>
    %c0_10 = arith.constant 0 : index
    %c0_11 = arith.constant 0 : index
    %16 = vector.load %arg6[%c0_10, %c0_11] : memref<32x4xbf16, #tpu.memory_space<vmem>>, vector<32x4xbf16>
    %cst_12 = arith.constant dense<0.000000e+00> : vector<2x4xf32>
    %17 = tpu.matmul %15, %16, %cst_12 {dimension_numbers = #tpu.dot_dimension_numbers<[1], [0], [0], [1], [0, 0, 1, 1], [], []>} : vector<2x32xbf16>, vector<32x4xbf16>, vector<2x4xf32> -> vector<2x4xf32>
    %c0_13 = arith.constant 0 : index
    %c0_14 = arith.constant 0 : index
    %18 = vector.load %arg7[%c0_13, %c0_14] : memref<2x4xf32, #tpu.memory_space<vmem>>, vector<2x4xf32>
    tpu.vector_store %arg7[%c0_13, %c0_14], %17 {strides = array<i32>} : memref<2x4xf32, #tpu.memory_space<vmem>>, vector<2x4xf32>,
    return
  }
  func.func @transform_0(%arg0: i32) -> (i32, i32) {
    %c0_i32 = arith.constant 0 : i32
    %c0_i32_0 = arith.constant 0 : i32
    return %arg0, %c0_i32 : i32, i32
  }
  func.func @transform_1(%arg0: i32) -> (i32, i32) {
    %c0_i32 = arith.constant 0 : i32
    %c0_i32_0 = arith.constant 0 : i32
    %c0_i32_1 = arith.constant 0 : i32
    return %c0_i32, %c0_i32_0 : i32, i32
  }
  func.func @transform_2(%arg0: i32) -> (i32, i32) {
    %c0_i32 = arith.constant 0 : i32
    %c0_i32_0 = arith.constant 0 : i32
    %c0_i32_1 = arith.constant 0 : i32
    return %c0_i32, %c0_i32_0 : i32, i32
  }
  func.func @transform_3(%arg0: i32) -> (i32, i32) {
    %c0_i32 = arith.constant 0 : i32
    %c0_i32_0 = arith.constant 0 : i32
    %c0_i32_1 = arith.constant 0 : i32
    return %c0_i32, %c0_i32_0 : i32, i32
  }
  func.func @transform_4(%arg0: i32) -> (i32, i32) {
    %c0_i32 = arith.constant 0 : i32
    %c0_i32_0 = arith.constant 0 : i32
    %c0_i32_1 = arith.constant 0 : i32
    return %c0_i32, %c0_i32_0 : i32, i32
  }
  func.func @transform_5(%arg0: i32) -> (i32, i32) {
    %c0_i32 = arith.constant 0 : i32
    %c0_i32_0 = arith.constant 0 : i32
    %c0_i32_1 = arith.constant 0 : i32
    return %c0_i32, %c0_i32_0 : i32, i32
  }
  func.func @transform_6(%arg0: i32) -> (i32, i32) {
    %c0_i32 = arith.constant 0 : i32
    %c0_i32_0 = arith.constant 0 : i32
    return %arg0, %c0_i32 : i32, i32
  }
}

</mosaic_0001>

<bundles_post_ra>
// kernel: tpu_custom_call.1
= control target key start
LH: loop header
LB: loop body
LE: loop exit
PB: predicated region body
PF: predicated region fallthrough
CT: control target
= control target key end

     0   :  { %vm39_vm0 = vcmask 1041408   ;;  %v303_v1 = vmov 0.0   ;;  %vm304_vm1 = vmmov 0   ;;  %vm35_vm2 = vcmask 31744   ;;  %s379_s0 = inlined_call_operand.vmem [shape: f32[2,4], index: 0, kind: input, shape index: {}]   ;;  %s380_s1 = inlined_call_operand.vmem [shape: bf16[4,32], index: 1, kind: input, shape index: {}]   ;;  %s381_s2 = inlined_call_operand.vmem [shape: f32[1,32], index: 2, kind: input, shape index: {}]   ;;  %s382_s3 = inlined_call_operand.vmem [shape: bf16[32,32], index: 3, kind: input, shape index: {}]   ;;  %s383_s4 = inlined_call_operand.vmem [shape: f32[1,32], index: 4, kind: input, shape index: {}]   ;;  %s384_s5 = inlined_call_operand.vmem [shape: bf16[32,4], index: 5, kind: input, shape index: {}]   ;;  %s385_s6 = inlined_call_operand.hbm [shape: f32[2,4], index: 6, kind: output, shape index: {}]  }
   0x1   :  { %v27_v0 = vld [vmem:[%s380_s1] sm:$0x3]  ;;  %246 = vmatprep.subr.bf16.mxu0 %v303_v1  ;;  %248 = vmatprep.mubr.msk.bf16.mxu0 %vm304_vm1, %v303_v1 }
   0x2   :  { %v41_v2 = vsel %vm39_vm0, %v27_v0, 0  ;;  %v25_v3 = vld [vmem:[%s379_s0] sm:$0x3]  ;;  %252 = vmatprep.subr.bf16.mxu1 %v303_v1  ;;  %256 = vmatprep.mubr.msk.bf16.mxu1 %vm304_vm1, %v303_v1 }
   0x3   :  { %247 = vmatpush3.bf16.msra.mxu0 %v41_v2  ;;  %v26_v4 = vpack.c.bf16 %v25_v3, %v25_v3 }
   0x4   :  { %260 = vmatprep.subr.bf16.mxu0 %v303_v1 }
   0x5   :  { %11 = vsyncpa [#allocation3], 0  ;;  %v271_v5 = vld [vmem:[%s382_s3] sm:$0xff]   ;;  %v272_v6 = vld [vmem:[%s382_s3 + $0x8] sm:$0xff]   ;;  %vm108_vm3 = vcmask 261120   ;;  %s305_s9 = smov [#allocation2]  }
   0x6   :  { %249 = vmatmul.mubr.msk.bf16.vlgmr.msra.gmra.mrb[0].mxu0 %vm35_vm2, %v26_v4  ;;  %253 = vmatpush3.bf16.msra.mxu1 %v271_v5  ;;  %v229_v7 = vld [vmem:[%s381_s2] ss:$0 sm:$0xff]  ;;  %v274_v16 = vld [vmem:[%s384_s5 + $0x8] sm:$0xff]   ;;  %s221_s10 = sshll.u32 %s305_s9, 4  ;;  %vm213_vm4 = vcmask 25600   ;;  %s222_s10 = int_to_ptr.vmem [resolvable:$true] %s221_s10 }
   0x7   :  { %264 = vmatprep.mubr.msk.bf16.mxu0 %vm304_vm1, %v303_v1  ;;  %254 = vmatprep.subr.bf16.mxu1 %v303_v1  ;;  %v273_v15 = vld [vmem:[%s384_s5] sm:$0xff]   ;;  %s279_s5 = scalar_lea.vmem %s222_s10, 32  ;;  %p284_p1 = scmp.lt.s32.totalorder %s222_s10, %s222_s10 }
   0x8   :  { %261 = vmatpush3.bf16.msra.mxu0 %v273_v15  ;;  %v231_v17 = vld [vmem:[%s383_s4] ss:$0 sm:$0xff]  ;;  %p280_p0 = scmp.ne.s32.totalorder %s222_s10, %s279_s5  ;;  %p285_p2 = scmp.lt.s32.totalorder %s279_s5, %s279_s5 }
   0x9   :  { %262 = vmatprep.subr.bf16.mxu0 %v303_v1 }
   0xa   :  { %255 = vmatpush3.bf16.msra.mxu1 %v272_v6  ;;  %p286_p3 = por %p285_p2, %p284_p1 }
   0xc   :  { %263 = vmatpush3.bf16.msra.mxu0 %v274_v16  ;;  %p287_p4 = pnand %p286_p3, %p280_p0 }
  0xd9   :  { %v77_v8 = vpop.f32.mrb[0].mxu0 }
  0xda   :  { %v78_v9 = vadd.f32 %v229_v7, %v77_v8  ;;  %v250_v10 = vpop.f32.mrb[1].mxu0 }
  0xdb   :  { %v80_v11 = vpop.f32.mrb[2].mxu0 }
  0xdc   :  { %275 = vtanh.f32 %v78_v9  ;;  %v251_v12 = vpop.f32.mrb[3].mxu0 }
  0xe6   :  { %v276_v13 = vpop.eup %275 }
  0xe7   :  { %v84_v14 = vpack.c.bf16 %v276_v13, %v276_v13 }
  0xe9   :  { %257 = vmatmul.mubr.msk.bf16.vlgmr.msra.gmra.mrb[0].mxu1 %vm108_vm3, %v84_v14 }
 0x1bc   :  { %v146_v18 = vpop.f32.mrb[0].mxu1 }
 0x1bd   :  { %v147_v19 = vadd.f32 %v231_v17, %v146_v18  ;;  %v258_v20 = vpop.f32.mrb[1].mxu1 }
 0x1be   :  { %v149_v21 = vpop.f32.mrb[2].mxu1 }
 0x1bf   :  { %277 = vtanh.f32 %v147_v19  ;;  %v259_v22 = vpop.f32.mrb[3].mxu1 }
 0x1c9   :  { %v278_v23 = vpop.eup %277 }
 0x1ca   :  { %v153_v24 = vpack.c.bf16 %v278_v23, %v278_v23 }
 0x1cc   :  { %265 = vmatmul.mubr.msk.bf16.vlgmr.msra.gmra.mrb[4].mxu0 %vm108_vm3, %v153_v24 }
 0x29f   :  { %v207_v25 = vpop.f32.mrb[4].mxu0 }
 0x2a0   :  { %214 = vst.msk [vmem:[#allocation2] sm:$0x3] %vm213_vm4, %v207_v25  ;;  %v266_v26 = vpop.f32.mrb[5].mxu0 }
 0x2a1   :  { %v210_v27 = vpop.f32.mrb[6].mxu0 }
 0x2a2   :  { %290 = shalt.err (!%p287_p4)
}
 0x2a3   :  { %s291_s12 = scalar_lea.hbm %s385_s6, 32 }
 0x2a4   :  { %p292_p5 = scmp.ne.s32.totalorder %s385_s6, %s291_s12  ;;  %p295_p6 = scmp.lt.u32.totalorder %s291_s12, %s385_s6 }
 0x2a6   :  { %p297_p7 = pnand %p295_p6, %p292_p5 }
 0x2a8   :  { %300 = shalt.err (!%p297_p7)
}
 0x2a9   :  { %224 = dma.vmem_to_hbm [thread:$0]  %s222_s10, 32, %s385_s6, [#allocation3]   ;;  %v267_v28 = vpop.f32.mrb[7].mxu0 }
 0x2aa   :  { %301 = dma.done.wait [#allocation3], 32  }
 0x2ab   :  { %302 = vsyncadd [#allocation3], 4294967264 }
 0x2ac   :  { %228 = vsyncpa [#allocation3], 1 }

</bundles_post_ra>
